<compile_context>
chip_gen: v7x
topology: tpu7x:2x2x1
jax: 0.10.0
libtpu: 0.0.40
codegen_flags: <defaults>
</compile_context>

<pallas_src>
import functools

import jax
import jax.numpy as jnp
from jax.experimental import pallas as pl
from jax.experimental.pallas import tpu as pltpu


def _round_up(x, m):
    return ((x + m - 1) // m) * m


def _layernorm(x, gamma, beta, eps=1e-5):
    # Two-pass variance (subtract mean, then square): matches PyTorch LayerNorm
    # and avoids catastrophic cancellation of E[x^2]-E[x]^2 when |mean| >> std.
    # The extra VPU pass over a (tm, H) tile is irrelevant for this HBM-bound
    # kernel; rsqrt lands on the EUP.
    mean = jnp.mean(x, axis=-1, keepdims=True)
    centered = x - mean
    var = jnp.mean(centered * centered, axis=-1, keepdims=True)
    return centered * jax.lax.rsqrt(var + eps) * gamma + beta


def _reward_decoder_kernel(matmul_dtype,
                           x_ref, w1_ref, g1_ref, b1_ref,
                           w2_ref, g2_ref, b2_ref,
                           wh_ref, bh_ref, out_ref, acc_ref):
    # Grid = (M tiles ['parallel'], K tiles ['arbitrary', innermost]).
    #
    # ROW-WISE INVARIANT: every op below acts independently per row.  This is
    # what makes the ragged last M-tile safe (garbage rows from the partial
    # block read never contaminate valid rows; their stores are masked).
    # Do not add cross-row ops (e.g. transformer pooling) to this kernel.
    k = pl.program_id(1)

    @pl.when(k == 0)
    def _():
        acc_ref[...] = jnp.zeros_like(acc_ref)

    # Layer-1 matmul, accumulated over K tiles in f32.
    acc_ref[...] += jnp.dot(x_ref[...].astype(matmul_dtype),
                            w1_ref[...].astype(matmul_dtype),
                            preferred_element_type=jnp.float32)

    @pl.when(k == pl.num_programs(1) - 1)
    def _():
        h = _layernorm(acc_ref[...], g1_ref[...], b1_ref[...])
        h = jnp.maximum(h, 0.0)
        h = jnp.dot(h.astype(matmul_dtype), w2_ref[...].astype(matmul_dtype),
                    preferred_element_type=jnp.float32)
        h = _layernorm(h, g2_ref[...], b2_ref[...])
        h = jnp.maximum(h, 0.0)
        out_ref[...] = (jnp.dot(h.astype(matmul_dtype),
                                wh_ref[...].astype(matmul_dtype),
                                preferred_element_type=jnp.float32)
                        + bh_ref[...])


def _vmem_capacity_bytes():
    try:
        return int(pltpu.get_tpu_info().vmem_capacity_bytes)
    except Exception:
        return 64 * 1024 * 1024      # conservative fallback (v7x per-TensorCore)


def _default_matmul_dtype(hidden_dim):
    # v5-class MXUs are bf16-native (f32 matmul is multi-pass emulation); flip
    # the default there once the contraction is big enough to matter.  Keep f32
    # everywhere else so results match the float32 PyTorch module to ~1e-4.
    try:
        kind = jax.devices()[0].device_kind.lower()
    except Exception:
        kind = ""
    if "v5" in kind and hidden_dim >= 512:
        return jnp.bfloat16
    return jnp.float32


def _pick_tile_k(K, cap=2048):
    """Contraction tile.  Full K unless K = N*D is big enough that the
    double-buffered (tm, K) feat tile is what would force tm down (v7x 64 MiB);
    then the largest multiple-of-128 divisor of K <= cap.  Exact division keeps
    the layer-1 accumulator free of garbage-tail contributions."""
    if K <= cap:
        return K
    t = (cap // 128) * 128
    while t >= 128:
        if K % t == 0:
            return t
        t -= 128
    return K


def _clamp_tm(tm, M, align):
    if M <= align:
        return M                          # full-dim block along M: always legal
    tm = min(tm, (M // align) * align)    # ragged last tile, block stays aligned
    return max(align, (tm // align) * align)


def _pick_tile_m(M, tk, H, C_out, feat_bytes, vmem_cap, align):
    """Rows per grid step.  Generation-aware: big tiles on 128 MiB single-TC
    parts (v5e/v6e), a >=2-step 'parallel' M axis on 64 MiB dual-TC parts
    (v7x); always a multiple of the sublane packing of the streamed dtype."""
    # Double-buffered weight / LN-param blocks are a fixed VMEM cost.
    fixed = 2 * 4 * (tk * H + H * H + H * C_out + 4 * H + 2 * C_out)
    budget = max((3 * vmem_cap) // 8 - fixed, 2 * 1024 * 1024)
    tm_cap = 4096 if vmem_cap >= 96 * 1024 * 1024 else 2048
    # dbl-buffered feat + out tiles, f32 accumulator, intermediate headroom
    row_bytes = 2 * tk * feat_bytes + 2 * C_out * 4 + 8 * H * 4
    tm = tm_cap
    while tm > align and tm * row_bytes > budget:
        tm //= 2
    # Dual-TensorCore parts (64 MiB/TC): ensure the 'parallel' M axis has >= 2
    # steps so both cores get work.  Single-TC 128 MiB parts keep one big tile;
    # splitting a fits-in-one-tile problem there is pure per-step overhead.
    if vmem_cap < 96 * 1024 * 1024 and M >= 512 and M <= tm:
        tm = _round_up((M + 1) // 2, align)
    return _clamp_tm(tm, M, align)


def reward_decoder_forward(feat, params, rt_pool_type="sum", *,
                           tm=None, tk=None,
                           feat_dtype=None, matmul_dtype=None,
                           pad_head_lanes=False, pool_in_wrapper=None):
    """feat: (B, L, N, D).  Returns (B, L, num_classes) float32.

    feat_dtype    : dtype the pooled features are streamed in.  bf16 halves the
                    dominant HBM read and the feat-tile VMEM (bigger tm), at
                    ~1e-2 accuracy vs the f32 reference.  Default: feat's dtype.
    matmul_dtype  : MXU input dtype (f32 accumulation either way).  Default f32,
                    auto-bf16 on v5-class parts at production hidden_dim.
    pad_head_lanes: lane-pad num_classes to a multiple of 128 (unmasked full-lane
                    stores).  Off by default: for small class counts the padded
                    HBM write-back costs more than the masked store saves.
    """
    assert rt_pool_type in ("sum", "first"), "transformer pooling not implemented"
    B, L, N, D = feat.shape
    M = B * L
    H = params["w1"].shape[1]
    C = params["wh"].shape[1]

    if rt_pool_type == "sum":
        if pool_in_wrapper is None:
            # The folded slot-sum (below) inflates layer-1 MXU work and W1
            # DMA/VMEM by N x.  Free while the kernel is HBM-bound (small /
            # medium H); at production H the MXU can become the binding slot,
            # so pre-pool in the wrapper instead.
            pool_in_wrapper = H >= 1024
        if pool_in_wrapper:
            x2 = feat.sum(axis=-2).reshape(M, D)
            w1_eff = params["w1"]
        else:
            # Fold the slot-sum into the first matmul:
            #   sum_n x[:, n, :] @ W1  ==  reshape(x, (M, N*D)) @ stack([W1]*N)
            # The reshape is free (contiguous); the reduction runs on the MXU.
            x2 = feat.reshape(M, N * D)
            w1_eff = jnp.tile(params["w1"], (N, 1))
    else:  # 'first'
        # TODO(synk): stream slot 0 straight from HBM (a (tm, 1, D) block on the
        # (M, N, D) view, or a manual strided DMA via memory_space=pl.ANY) to
        # drop this wrapper slice's extra M*D write+read; a size-1 block on the
        # second-minor slot dim conflicts with the documented (8,128) BlockSpec
        # rule, so the safe wrapper slice is kept here.
        x2 = feat[:, :, 0, :].reshape(M, D)
        w1_eff = params["w1"]

    if feat_dtype is None:
        feat_dtype = x2.dtype
    else:
        x2 = x2.astype(feat_dtype)
    feat_bytes = jnp.dtype(feat_dtype).itemsize
    align = 8 * (4 // feat_bytes)             # f32: 8 sublanes, bf16: 16, int8: 32

    if matmul_dtype is None:
        matmul_dtype = _default_matmul_dtype(H)

    K = x2.shape[1]
    if tk is None:
        tk = _pick_tile_k(K)
    assert K % tk == 0 and (tk == K or tk % 128 == 0), (K, tk)

    # Head / output width.  Unpadded by default (see docstring).
    if pad_head_lanes:
        C_out = _round_up(C, 128)
        wh = jnp.pad(params["wh"], ((0, 0), (0, C_out - C)))
        bh = jnp.pad(params["bh"], ((0, 0), (0, C_out - C)))
    else:
        C_out = C
        wh, bh = params["wh"], params["bh"]

    vmem_cap = _vmem_capacity_bytes()
    if tm is None:
        tm = _pick_tile_m(M, tk, H, C_out, feat_bytes, vmem_cap, align)
    else:
        tm = _clamp_tm(tm, M, align)

    # Ragged M handled with a partial last tile (grid = cdiv): no jnp.pad of the
    # (M, K) feature slab, i.e. no extra full-slab HBM read + write.
    grid = (pl.cdiv(M, tm), K // tk)

    # NOTE: the constant-index weight / LN-param blocks are double-buffered by
    # Pallas by default; at production H, single-buffering them (e.g. via
    # pipeline_mode=pl.Buffered(1)) would reclaim a few MiB of VMEM for tm.
    # Their doubled footprint is accounted for in the tile budget instead.
    fixed_params = 2 * 4 * (tk * H + H * H + H * C_out + 4 * H + 2 * C_out)
    vmem_need = (2 * tm * tk * feat_bytes      # double-buffered feat tile
                 + 2 * tm * C_out * 4          # double-buffered out tile
                 + tm * H * 4                  # f32 accumulator scratch
                 + 4 * tm * H * 4              # intermediate headroom
                 + fixed_params)
    # Cap well under physical VMEM of the current part (~40 MiB on a 64 MiB v7x
    # core, ~80 MiB on 128 MiB v5e/v6e) to leave compiler-internal scratch room.
    vmem_limit = int(min(max(2 * vmem_need, 8 * 1024 * 1024), (5 * vmem_cap) // 8))

    cost = pl.CostEstimate(
        flops=2 * M * (K * H + H * H + H * C_out),
        transcendentals=2 * M,                 # one rsqrt per LN row (x2 LNs)
        bytes_accessed=(feat_bytes * M * K
                        + 4 * (M * C_out + K * H + H * H + H * C_out
                               + 4 * H + 2 * C_out)),
    )

    kernel = functools.partial(_reward_decoder_kernel, matmul_dtype)
    const = lambda i, k: (0, 0)

    out = pl.pallas_call(
        kernel,
        out_shape=jax.ShapeDtypeStruct((M, C_out), jnp.float32),
        grid_spec=pltpu.PrefetchScalarGridSpec(
            num_scalar_prefetch=0,
            grid=grid,
            in_specs=[
                pl.BlockSpec((tm, tk), lambda i, k: (i, k)),   # streamed feat tile
                pl.BlockSpec((tk, H), lambda i, k: (k, 0)),    # W1 (maybe slot-stacked)
                pl.BlockSpec((1, H), const),                   # ln1 gamma
                pl.BlockSpec((1, H), const),                   # ln1 beta
                pl.BlockSpec((H, H), const),                   # W2
                pl.BlockSpec((1, H), const),                   # ln2 gamma
                pl.BlockSpec((1, H), const),                   # ln2 beta
                pl.BlockSpec((H, C_out), const),               # Wh
                pl.BlockSpec((1, C_out), const),               # bh
            ],
            out_specs=pl.BlockSpec((tm, C_out), lambda i, k: (i, 0)),
            scratch_shapes=[pltpu.VMEM((tm, H), jnp.float32)], # layer-1 accumulator
        ),
        compiler_params=pltpu.CompilerParams(
            dimension_semantics=("parallel", "arbitrary"),
            vmem_limit_bytes=vmem_limit),
        cost_estimate=cost,
    )(x2, w1_eff, params["g1"], params["b1"],
      params["w2"], params["g2"], params["b2"], wh, bh)

    if pad_head_lanes:
        out = out[:, :C]
    return out.reshape(B, L, C)


def reference_forward(feat, params, rt_pool_type="sum"):
    if rt_pool_type == "first":
        pooled = feat[:, :, 0]
    else:
        pooled = feat.sum(axis=-2)
    h = pooled @ params["w1"]
    h = _layernorm(h, params["g1"][0], params["b1"][0])
    h = jnp.maximum(h, 0.0)
    h = h @ params["w2"]
    h = _layernorm(h, params["g2"][0], params["b2"][0])
    h = jnp.maximum(h, 0.0)
    return h @ params["wh"] + params["bh"][0]


def init_params(key, input_dim, hidden_dim, num_classes):
    k1, k2, k3, k4 = jax.random.split(key, 4)
    # Linear weights stored pre-transposed: (in, out), so y = x @ W.
    return {
        "w1": jax.random.normal(k1, (input_dim, hidden_dim), jnp.float32) * 0.05,
        "g1": jnp.ones((1, hidden_dim), jnp.float32),
        "b1": jnp.zeros((1, hidden_dim), jnp.float32),
        "w2": jax.random.normal(k2, (hidden_dim, hidden_dim), jnp.float32) * 0.05,
        "g2": jnp.ones((1, hidden_dim), jnp.float32),
        "b2": jnp.zeros((1, hidden_dim), jnp.float32),
        "wh": jax.random.normal(k3, (hidden_dim, num_classes), jnp.float32) * 0.05,
        "bh": jax.random.normal(k4, (1, num_classes), jnp.float32) * 0.01,
    }


if __name__ == "__main__":
    key = jax.random.PRNGKey(0)
    kf, kp = jax.random.split(key)

    # Config 1: small shapes consistent with the module.
    B, L, N, D = 2, 8, 4, 32        # batch, seq, slots, input_dim
    H, C = 32, 16                   # hidden_dim, num_classes
    feat = jax.random.normal(kf, (B, L, N, D), jnp.float32)
    params = init_params(kp, D, H, C)

    for pool in ("sum", "first"):
        out = jax.block_until_ready(
            reward_decoder_forward(feat, params, rt_pool_type=pool))
        ref = reference_forward(feat, params, rt_pool_type=pool)
        assert out.shape == (B, L, C), out.shape
        err = float(jnp.max(jnp.abs(out - ref)))
        assert err < 1e-4, (pool, err)

    # Ragged M (B*L = 10 with an 8-row tile) exercises the partial-last-tile
    # path (no wrapper jnp.pad of the feature slab).
    feat_r = jax.random.normal(kf, (2, 5, N, D), jnp.float32)
    out = jax.block_until_ready(
        reward_decoder_forward(feat_r, params, rt_pool_type="sum", tm=8))
    ref = reference_forward(feat_r, params, rt_pool_type="sum")
    assert float(jnp.max(jnp.abs(out - ref))) < 1e-4

    # Config 2: larger K with explicit K-tiling (2 'arbitrary' k-steps).
    D2 = 64
    feat2 = jax.random.normal(kf, (B, L, N, D2), jnp.float32)
    params2 = init_params(kp, D2, H, C)
    out = jax.block_until_ready(
        reward_decoder_forward(feat2, params2, rt_pool_type="sum", tm=8, tk=128))
    ref2 = reference_forward(feat2, params2, rt_pool_type="sum")
    assert float(jnp.max(jnp.abs(out - ref2))) < 1e-4

    # bf16 streaming fast path (looser tolerance vs the f32 reference).
    out_bf16 = jax.block_until_ready(
        reward_decoder_forward(feat2, params2, rt_pool_type="sum",
                               feat_dtype=jnp.bfloat16,
                               matmul_dtype=jnp.bfloat16))
    assert float(jnp.max(jnp.abs(out_bf16 - ref2))) < 5e-2

    # Lane-padded head store path still available.
    out_pad = jax.block_until_ready(
        reward_decoder_forward(feat, params, rt_pool_type="sum",
                               pad_head_lanes=True))
    ref = reference_forward(feat, params, rt_pool_type="sum")
    assert float(jnp.max(jnp.abs(out_pad - ref))) < 1e-4

    print("KERNEL_OK")
</pallas_src>

<mosaic_0001>
module attributes {stable_mosaic.version = 11 : i64} {
  func.func @_reward_decoder_kernel(%arg0: i32, %arg1: i32, %arg2: memref<16x128xf32, #tpu.memory_space<vmem>>, %arg3: memref<128x32xf32, #tpu.memory_space<vmem>>, %arg4: memref<1x32xf32, #tpu.memory_space<vmem>>, %arg5: memref<1x32xf32, #tpu.memory_space<vmem>>, %arg6: memref<32x32xf32, #tpu.memory_space<vmem>>, %arg7: memref<1x32xf32, #tpu.memory_space<vmem>>, %arg8: memref<1x32xf32, #tpu.memory_space<vmem>>, %arg9: memref<32x16xf32, #tpu.memory_space<vmem>>, %arg10: memref<1x16xf32, #tpu.memory_space<vmem>>, %arg11: memref<16x16xf32, #tpu.memory_space<vmem>>, %arg12: memref<16x32xf32, #tpu.memory_space<vmem>>) attributes {dimension_semantics = [#tpu.dimension_semantics<parallel>, #tpu.dimension_semantics<arbitrary>], iteration_bounds = array<i64: 1, 1>, scalar_prefetch = 0 : i64, scratch_operands = 1 : i64, tpu.core_type = #tpu.core_type<tc>, window_params = [{transform_indices = @transform_0, window_bounds = array<i64: 16, 128>}, {transform_indices = @transform_1, window_bounds = array<i64: 128, 32>}, {pipeline_mode = #tpu.pipeline_mode<synchronous>, transform_indices = @transform_2, window_bounds = array<i64: 1, 32>}, {pipeline_mode = #tpu.pipeline_mode<synchronous>, transform_indices = @transform_3, window_bounds = array<i64: 1, 32>}, {pipeline_mode = #tpu.pipeline_mode<synchronous>, transform_indices = @transform_4, window_bounds = array<i64: 32, 32>}, {pipeline_mode = #tpu.pipeline_mode<synchronous>, transform_indices = @transform_5, window_bounds = array<i64: 1, 32>}, {pipeline_mode = #tpu.pipeline_mode<synchronous>, transform_indices = @transform_6, window_bounds = array<i64: 1, 32>}, {pipeline_mode = #tpu.pipeline_mode<synchronous>, transform_indices = @transform_7, window_bounds = array<i64: 32, 16>}, {pipeline_mode = #tpu.pipeline_mode<synchronous>, transform_indices = @transform_8, window_bounds = array<i64: 1, 16>}, {transform_indices = @transform_9, window_bounds = array<i64: 16, 16>}]} {
    %c0_i32 = arith.constant 0 : i32
    %0 = arith.cmpi eq, %arg1, %c0_i32 : i32
    %1 = arith.extui %0 : i1 to i32
    %c0_i32_0 = arith.constant 0 : i32
    %2 = arith.cmpi ne, %1, %c0_i32_0 : i32
    scf.if %2 {
      %cst_10 = arith.constant 0.000000e+00 : f32
      %12 = vector.broadcast %cst_10 : f32 to vector<16x32xf32>
      %c0_11 = arith.constant 0 : index
      %c0_12 = arith.constant 0 : index
      %13 = vector.load %arg12[%c0_11, %c0_12] : memref<16x32xf32, #tpu.memory_space<vmem>>, vector<16x32xf32>
      tpu.vector_store %arg12[%c0_11, %c0_12], %12 {strides = array<i32>} : memref<16x32xf32, #tpu.memory_space<vmem>>, vector<16x32xf32>,
    } else {
    }
    %c0 = arith.constant 0 : index
    %c0_1 = arith.constant 0 : index
    %3 = vector.load %arg12[%c0, %c0_1] : memref<16x32xf32, #tpu.memory_space<vmem>>, vector<16x32xf32>
    %c0_2 = arith.constant 0 : index
    %c0_3 = arith.constant 0 : index
    %4 = vector.load %arg2[%c0_2, %c0_3] : memref<16x128xf32, #tpu.memory_space<vmem>>, vector<16x128xf32>
    %c0_4 = arith.constant 0 : index
    %c0_5 = arith.constant 0 : index
    %5 = vector.load %arg3[%c0_4, %c0_5] : memref<128x32xf32, #tpu.memory_space<vmem>>, vector<128x32xf32>
    %cst = arith.constant dense<0.000000e+00> : vector<16x32xf32>
    %6 = tpu.matmul %4, %5, %cst {dimension_numbers = #tpu.dot_dimension_numbers<[1], [0], [0], [1], [0, 0, 1, 1], [], []>} : vector<16x128xf32>, vector<128x32xf32>, vector<16x32xf32> -> vector<16x32xf32>
    %7 = arith.addf %3, %6 : vector<16x32xf32>
    %c0_6 = arith.constant 0 : index
    %c0_7 = arith.constant 0 : index
    %8 = vector.load %arg12[%c0_6, %c0_7] : memref<16x32xf32, #tpu.memory_space<vmem>>, vector<16x32xf32>
    tpu.vector_store %arg12[%c0_6, %c0_7], %7 {strides = array<i32>} : memref<16x32xf32, #tpu.memory_space<vmem>>, vector<16x32xf32>,
    %c0_i32_8 = arith.constant 0 : i32
    %9 = arith.cmpi eq, %arg1, %c0_i32_8 : i32
    %10 = arith.extui %9 : i1 to i32
    %c0_i32_9 = arith.constant 0 : i32
    %11 = arith.cmpi ne, %10, %c0_i32_9 : i32
    scf.if %11 {
      %c0_10 = arith.constant 0 : index
      %c0_11 = arith.constant 0 : index
      %12 = vector.load %arg12[%c0_10, %c0_11] : memref<16x32xf32, #tpu.memory_space<vmem>>, vector<16x32xf32>
      %c0_12 = arith.constant 0 : index
      %c0_13 = arith.constant 0 : index
      %13 = vector.load %arg4[%c0_12, %c0_13] : memref<1x32xf32, #tpu.memory_space<vmem>>, vector<1x32xf32>
      %c0_14 = arith.constant 0 : index
      %c0_15 = arith.constant 0 : index
      %14 = vector.load %arg5[%c0_14, %c0_15] : memref<1x32xf32, #tpu.memory_space<vmem>>, vector<1x32xf32>
      %cst_16 = arith.constant dense<0.000000e+00> : vector<16xf32>
      %15 = vector.multi_reduction <add>, %12, %cst_16 [1] : vector<16x32xf32> to vector<16xf32>
      %16 = vector.shape_cast %15 : vector<16xf32> to vector<16x1xf32>
      %cst_17 = arith.constant 3.200000e+01 : f32
      %17 = vector.broadcast %cst_17 : f32 to vector<16x1xf32>
      %18 = arith.divf %16, %17 : vector<16x1xf32>
      %19 = vector.broadcast %18 : vector<16x1xf32> to vector<16x32xf32>
      %20 = arith.subf %12, %19 : vector<16x32xf32>
      %21 = arith.mulf %20, %20 : vector<16x32xf32>
      %cst_18 = arith.constant dense<0.000000e+00> : vector<16xf32>
      %22 = vector.multi_reduction <add>, %21, %cst_18 [1] : vector<16x32xf32> to vector<16xf32>
      %23 = vector.shape_cast %22 : vector<16xf32> to vector<16x1xf32>
      %cst_19 = arith.constant 3.200000e+01 : f32
      %24 = vector.broadcast %cst_19 : f32 to vector<16x1xf32>
      %25 = arith.divf %23, %24 : vector<16x1xf32>
      %cst_20 = arith.constant 9.99999974E-6 : f32
      %26 = vector.broadcast %cst_20 : f32 to vector<16x1xf32>
      %27 = arith.addf %25, %26 : vector<16x1xf32>
      %28 = math.rsqrt %27 : vector<16x1xf32>
      %29 = vector.broadcast %28 : vector<16x1xf32> to vector<16x32xf32>
      %30 = arith.mulf %20, %29 : vector<16x32xf32>
      %31 = vector.broadcast %13 : vector<1x32xf32> to vector<16x32xf32>
      %32 = arith.mulf %30, %31 : vector<16x32xf32>
      %33 = vector.broadcast %14 : vector<1x32xf32> to vector<16x32xf32>
      %34 = arith.addf %32, %33 : vector<16x32xf32>
      %cst_21 = arith.constant 0.000000e+00 : f32
      %35 = vector.broadcast %cst_21 : f32 to vector<16x32xf32>
      %36 = arith.maximumf %34, %35 : vector<16x32xf32>
      %c0_22 = arith.constant 0 : index
      %c0_23 = arith.constant 0 : index
      %37 = vector.load %arg6[%c0_22, %c0_23] : memref<32x32xf32, #tpu.memory_space<vmem>>, vector<32x32xf32>
      %cst_24 = arith.constant dense<0.000000e+00> : vector<16x32xf32>
      %38 = tpu.matmul %36, %37, %cst_24 {dimension_numbers = #tpu.dot_dimension_numbers<[1], [0], [0], [1], [0, 0, 1, 1], [], []>} : vector<16x32xf32>, vector<32x32xf32>, vector<16x32xf32> -> vector<16x32xf32>
      %c0_25 = arith.constant 0 : index
      %c0_26 = arith.constant 0 : index
      %39 = vector.load %arg7[%c0_25, %c0_26] : memref<1x32xf32, #tpu.memory_space<vmem>>, vector<1x32xf32>
      %c0_27 = arith.constant 0 : index
      %c0_28 = arith.constant 0 : index
      %40 = vector.load %arg8[%c0_27, %c0_28] : memref<1x32xf32, #tpu.memory_space<vmem>>, vector<1x32xf32>
      %cst_29 = arith.constant dense<0.000000e+00> : vector<16xf32>
      %41 = vector.multi_reduction <add>, %38, %cst_29 [1] : vector<16x32xf32> to vector<16xf32>
      %42 = vector.shape_cast %41 : vector<16xf32> to vector<16x1xf32>
      %cst_30 = arith.constant 3.200000e+01 : f32
      %43 = vector.broadcast %cst_30 : f32 to vector<16x1xf32>
      %44 = arith.divf %42, %43 : vector<16x1xf32>
      %45 = vector.broadcast %44 : vector<16x1xf32> to vector<16x32xf32>
      %46 = arith.subf %38, %45 : vector<16x32xf32>
      %47 = arith.mulf %46, %46 : vector<16x32xf32>
      %cst_31 = arith.constant dense<0.000000e+00> : vector<16xf32>
      %48 = vector.multi_reduction <add>, %47, %cst_31 [1] : vector<16x32xf32> to vector<16xf32>
      %49 = vector.shape_cast %48 : vector<16xf32> to vector<16x1xf32>
      %cst_32 = arith.constant 3.200000e+01 : f32
      %50 = vector.broadcast %cst_32 : f32 to vector<16x1xf32>
      %51 = arith.divf %49, %50 : vector<16x1xf32>
      %cst_33 = arith.constant 9.99999974E-6 : f32
      %52 = vector.broadcast %cst_33 : f32 to vector<16x1xf32>
      %53 = arith.addf %51, %52 : vector<16x1xf32>
      %54 = math.rsqrt %53 : vector<16x1xf32>
      %55 = vector.broadcast %54 : vector<16x1xf32> to vector<16x32xf32>
      %56 = arith.mulf %46, %55 : vector<16x32xf32>
      %57 = vector.broadcast %39 : vector<1x32xf32> to vector<16x32xf32>
      %58 = arith.mulf %56, %57 : vector<16x32xf32>
      %59 = vector.broadcast %40 : vector<1x32xf32> to vector<16x32xf32>
      %60 = arith.addf %58, %59 : vector<16x32xf32>
      %cst_34 = arith.constant 0.000000e+00 : f32
      %61 = vector.broadcast %cst_34 : f32 to vector<16x32xf32>
      %62 = arith.maximumf %60, %61 : vector<16x32xf32>
      %c0_35 = arith.constant 0 : index
      %c0_36 = arith.constant 0 : index
      %63 = vector.load %arg9[%c0_35, %c0_36] : memref<32x16xf32, #tpu.memory_space<vmem>>, vector<32x16xf32>
      %cst_37 = arith.constant dense<0.000000e+00> : vector<16x16xf32>
      %64 = tpu.matmul %62, %63, %cst_37 {dimension_numbers = #tpu.dot_dimension_numbers<[1], [0], [0], [1], [0, 0, 1, 1], [], []>} : vector<16x32xf32>, vector<32x16xf32>, vector<16x16xf32> -> vector<16x16xf32>
      %c0_38 = arith.constant 0 : index
      %c0_39 = arith.constant 0 : index
      %65 = vector.load %arg10[%c0_38, %c0_39] : memref<1x16xf32, #tpu.memory_space<vmem>>, vector<1x16xf32>
      %66 = vector.broadcast %65 : vector<1x16xf32> to vector<16x16xf32>
      %67 = arith.addf %64, %66 : vector<16x16xf32>
      %c0_40 = arith.constant 0 : index
      %c0_41 = arith.constant 0 : index
      %68 = vector.load %arg11[%c0_40, %c0_41] : memref<16x16xf32, #tpu.memory_space<vmem>>, vector<16x16xf32>
      tpu.vector_store %arg11[%c0_40, %c0_41], %67 {strides = array<i32>} : memref<16x16xf32, #tpu.memory_space<vmem>>, vector<16x16xf32>,
    } else {
    }
    return
  }
  func.func @transform_0(%arg0: i32, %arg1: i32) -> (i32, i32) {
    %c0_i32 = arith.constant 0 : i32
    return %arg0, %arg1 : i32, i32
  }
  func.func @transform_1(%arg0: i32, %arg1: i32) -> (i32, i32) {
    %c0_i32 = arith.constant 0 : i32
    %c0_i32_0 = arith.constant 0 : i32
    return %arg1, %c0_i32 : i32, i32
  }
  func.func @transform_2(%arg0: i32, %arg1: i32) -> (i32, i32) {
    %c0_i32 = arith.constant 0 : i32
    %c0_i32_0 = arith.constant 0 : i32
    %c0_i32_1 = arith.constant 0 : i32
    return %c0_i32, %c0_i32_0 : i32, i32
  }
  func.func @transform_3(%arg0: i32, %arg1: i32) -> (i32, i32) {
    %c0_i32 = arith.constant 0 : i32
    %c0_i32_0 = arith.constant 0 : i32
    %c0_i32_1 = arith.constant 0 : i32
    return %c0_i32, %c0_i32_0 : i32, i32
  }
  func.func @transform_4(%arg0: i32, %arg1: i32) -> (i32, i32) {
    %c0_i32 = arith.constant 0 : i32
    %c0_i32_0 = arith.constant 0 : i32
    %c0_i32_1 = arith.constant 0 : i32
    return %c0_i32, %c0_i32_0 : i32, i32
  }
  func.func @transform_5(%arg0: i32, %arg1: i32) -> (i32, i32) {
    %c0_i32 = arith.constant 0 : i32
    %c0_i32_0 = arith.constant 0 : i32
    %c0_i32_1 = arith.constant 0 : i32
    return %c0_i32, %c0_i32_0 : i32, i32
  }
  func.func @transform_6(%arg0: i32, %arg1: i32) -> (i32, i32) {
    %c0_i32 = arith.constant 0 : i32
    %c0_i32_0 = arith.constant 0 : i32
    %c0_i32_1 = arith.constant 0 : i32
    return %c0_i32, %c0_i32_0 : i32, i32
  }
  func.func @transform_7(%arg0: i32, %arg1: i32) -> (i32, i32) {
    %c0_i32 = arith.constant 0 : i32
    %c0_i32_0 = arith.constant 0 : i32
    %c0_i32_1 = arith.constant 0 : i32
    return %c0_i32, %c0_i32_0 : i32, i32
  }
  func.func @transform_8(%arg0: i32, %arg1: i32) -> (i32, i32) {
    %c0_i32 = arith.constant 0 : i32
    %c0_i32_0 = arith.constant 0 : i32
    %c0_i32_1 = arith.constant 0 : i32
    return %c0_i32, %c0_i32_0 : i32, i32
  }
  func.func @transform_9(%arg0: i32, %arg1: i32) -> (i32, i32) {
    %c0_i32 = arith.constant 0 : i32
    %c0_i32_0 = arith.constant 0 : i32
    return %arg0, %c0_i32 : i32, i32
  }
}

</mosaic_0001>

<bundles_post_ra>
// kernel: tpu_custom_call.1
= control target key start
LH: loop header
LB: loop body
LE: loop exit
PB: predicated region body
PF: predicated region fallthrough
CT: control target
= control target key end

     0   :  { %vm37_vm0 = vcmask 261120   ;;  %v614_v5 = vmov 0.0   ;;  %s789_s0 = inlined_call_operand.vmem [shape: f32[16,128], index: 0, kind: input, shape index: {}]   ;;  %s790_s1 = inlined_call_operand.vmem [shape: f32[128,32], index: 1, kind: input, shape index: {}]   ;;  %s791_s2 = inlined_call_operand.vmem [shape: f32[1,32], index: 2, kind: input, shape index: {}]   ;;  %s792_s3 = inlined_call_operand.vmem [shape: f32[1,32], index: 3, kind: input, shape index: {}]   ;;  %s793_s4 = inlined_call_operand.vmem [shape: f32[32,32], index: 4, kind: input, shape index: {}]   ;;  %s794_s5 = inlined_call_operand.vmem [shape: f32[1,32], index: 5, kind: input, shape index: {}]   ;;  %s795_s6 = inlined_call_operand.vmem [shape: f32[1,32], index: 6, kind: input, shape index: {}]   ;;  %s796_s7 = inlined_call_operand.vmem [shape: f32[32,16], index: 7, kind: input, shape index: {}]   ;;  %s797_s8 = inlined_call_operand.vmem [shape: f32[1,16], index: 8, kind: input, shape index: {}]   ;;  %s798_s9 = inlined_call_operand.hbm [shape: f32[16,16], index: 9, kind: output, shape index: {}]  }
   0x1   :  { %v44_v0 = vld [vmem:[%s790_s1] sm:$0xff]  ;;  %v45_v1 = vld [vmem:[%s790_s1 + $0x8] sm:$0xff]  ;;  %v46_v2 = vld [vmem:[%s790_s1 + $0x10] sm:$0xff]  ;;  %39 = vst.msk [vmem:[#allocation2 + $0x8] sm:$0xff] %vm37_vm0, %v614_v5 }
   0x2   :  { %v530_v3 = vpack.c.bf16 %v45_v1, %v44_v0  ;;  %v47_v4 = vld [vmem:[%s790_s1 + $0x18] sm:$0xff]  ;;  %38 = vst.msk [vmem:[#allocation2] sm:$0xff] %vm37_vm0, %v614_v5  ;;  %v48_v7 = vld [vmem:[%s790_s1 + $0x20] sm:$0xff]  ;;  %v49_v8 = vld [vmem:[%s790_s1 + $0x28] sm:$0xff] }
   0x3   :  { %v534_v6 = vpack.c.bf16 %v47_v4, %v46_v2  ;;  %v538_v9 = vpack.c.bf16 %v49_v8, %v48_v7  ;;  %v42_v10 = vld [vmem:[%s789_s0] sm:$0xff]  ;;  %v50_v11 = vld [vmem:[%s790_s1 + $0x30] sm:$0xff]  ;;  %v51_v12 = vld [vmem:[%s790_s1 + $0x38] sm:$0xff] }
   0x4   :  { %531 = vmatprep.subr.bf16.mxu0 %v530_v3  ;;  %505 = vmatprep.mubr.f32.mxu0 %v42_v10 }
   0x5   :  { %533 = vmatpush3.bf16.msra.mxu0 %v530_v3 }
   0x6   :  { %535 = vmatprep.subr.bf16.mxu0 %v534_v6 }
   0x7   :  { %14 = vsyncpa [#allocation4], 0  ;;  %v542_v13 = vpack.c.bf16 %v51_v12, %v50_v11  ;;  %v52_v14 = vld [vmem:[%s790_s1 + $0x40] sm:$0xff]  ;;  %v53_v15 = vld [vmem:[%s790_s1 + $0x48] sm:$0xff]  ;;  %vm415_vm1 = vcmask 130048  }
   0x8   :  { %v546_v16 = vpack.c.bf16 %v53_v15, %v52_v14  ;;  %v54_v17 = vld [vmem:[%s790_s1 + $0x50] sm:$0xff]  ;;  %v55_v18 = vld [vmem:[%s790_s1 + $0x58] sm:$0xff]  ;;  %v56_v20 = vld [vmem:[%s790_s1 + $0x60] sm:$0xff] }
   0x9   :  { %537 = vmatpush3.bf16.msra.mxu0 %v534_v6  ;;  %v550_v19 = vpack.c.bf16 %v55_v18, %v54_v17  ;;  %v57_v21 = vld [vmem:[%s790_s1 + $0x68] sm:$0xff]  ;;  %v58_v23 = vld [vmem:[%s790_s1 + $0x70] sm:$0xff]  ;;  %v59_v24 = vld [vmem:[%s790_s1 + $0x78] sm:$0xff] }
   0xa   :  { %539 = vmatprep.subr.bf16.mxu0 %v538_v9  ;;  %v554_v22 = vpack.c.bf16 %v57_v21, %v56_v20  ;;  %v558_v25 = vpack.c.bf16 %v59_v24, %v58_v23  ;;  %v43_v26 = vld [vmem:[%s789_s0 + $0x8] sm:$0xff]  ;;  %v40_v28 = vld [vmem:[#allocation2] sm:$0xff]  ;;  %v194_v49 = vld [vmem:[%s793_s4 + $0x10] sm:$0xff] }
   0xb   :  { %v41_v27 = vld [vmem:[#allocation2 + $0x8] sm:$0xff]  ;;  %v192_v47 = vld [vmem:[%s793_s4] sm:$0xff]  ;;  %v195_v51 = vld [vmem:[%s793_s4 + $0x18] sm:$0xff] }
   0xc   :  { %v193_v48 = vld [vmem:[%s793_s4 + $0x8] sm:$0xff]  ;;  %v566_v52 = vpack.c.bf16 %v195_v51, %v194_v49  ;;  %v434_v60 = vld [vmem:[%s791_s2] ss:$0 sm:$0xff]  ;;  %v325_v24 = vld [vmem:[%s796_s7 + $0x10] sm:$0xff] }
   0xd   :  { %541 = vmatpush3.bf16.msra.mxu0 %v538_v9  ;;  %v562_v50 = vpack.c.bf16 %v193_v48, %v192_v47  ;;  %v435_v62 = vld [vmem:[%s792_s3] ss:$0 sm:$0xff] }
   0xe   :  { %543 = vmatprep.subr.bf16.mxu0 %v542_v13  ;;  %v323_v21 = vld [vmem:[%s796_s7] sm:$0xff] }
   0xf   :  { %563 = vmatprep.subr.bf16.mxu1 %v562_v50 }
  0x10   :  { %565 = vmatpush3.bf16.msra.mxu1 %v562_v50 }
  0x11   :  { %545 = vmatpush3.bf16.msra.mxu0 %v542_v13  ;;  %567 = vmatprep.subr.bf16.mxu1 %v566_v52 }
  0x12   :  { %547 = vmatprep.subr.bf16.mxu0 %v546_v16 }
  0x14   :  { %569 = vmatpush3.bf16.msra.mxu1 %v566_v52 }
  0x15   :  { %549 = vmatpush3.bf16.msra.mxu0 %v546_v16 }
  0x16   :  { %551 = vmatprep.subr.bf16.mxu0 %v550_v19 }
  0x19   :  { %553 = vmatpush3.bf16.msra.mxu0 %v550_v19 }
  0x1a   :  { %555 = vmatprep.subr.bf16.mxu0 %v554_v22 }
  0x1d   :  { %557 = vmatpush3.bf16.msra.mxu0 %v554_v22  ;;  %v324_v22 = vld [vmem:[%s796_s7 + $0x8] sm:$0xff] }
  0x1e   :  { %559 = vmatprep.subr.bf16.mxu0 %v558_v25  ;;  %v570_v23 = vpack.c.bf16 %v324_v22, %v323_v21 }
  0x20   :  { %571 = vmatprep.subr.bf16.mxu1 %v570_v23 }
  0x21   :  { %561 = vmatpush3.bf16.msra.mxu0 %v558_v25  ;;  %v326_v25 = vld [vmem:[%s796_s7 + $0x18] sm:$0xff] }
  0x24   :  { %506 = vmatmul.mubr.f32.vlgmr.msra.gmra.mrb[0].mxu0 %v43_v26  ;;  %v574_v26 = vpack.c.bf16 %v326_v25, %v325_v24 }
  0xf7   :  { %v507_v29 = vpop.f32.mrb[0].mxu0 }
  0xf8   :  { %v136_v30 = vadd.f32 %v507_v29, %v41_v27  ;;  %v126_v31 = vpop.f32.mrb[1].mxu0 }
  0xf9   :  { %v135_v32 = vadd.f32 %v126_v31, %v40_v28 }
  0xfa   :  { %139 = vst.msk [vmem:[#allocation2 + $0x8] sm:$0xff] %vm37_vm0, %v136_v30 }
  0xfb   :  { %138 = vst.msk [vmem:[#allocation2] sm:$0xff] %vm37_vm0, %v135_v32 }
 0x101   :  { %v144_v35 = vld [vmem:[#allocation2 + $0x8] sm:$0xff] }
 0x102   :  { %v143_v33 = vld [vmem:[#allocation2] sm:$0xff]  ;;  %v150_v36 = vsel %vm37_vm0, %v144_v35, 0.0 }
 0x103   :  { %v147_v34 = vsel %vm37_vm0, %v143_v33, 0.0 }
 0x104   :  { %148 = vadd.xlane.f32.xlu0 %v147_v34  ;;  %v438_v34 = vld [vmem:[%s794_s5] ss:$0 sm:$0xff]  ;;  %s615_s5 = smov [#allocation3]  }
 0x105   :  { %s423_s23 = sshll.u32 %s615_s5, 4  ;;  %s424_s23 = int_to_ptr.vmem [resolvable:$true] %s423_s23 }
 0x106   :  { %p595_p1 = scmp.lt.s32.totalorder %s424_s23, %s424_s23 }
 0x108   :  { %151 = vadd.xlane.f32.xlu0 %v150_v36 }
 0x191   :  { %v149_v37 = vpop.xlane.xlu0 %148 }
 0x192   :  { %v154_v38 = vmul.f32 0.03125, %v149_v37 }
 0x194   :  { %v156_v39 = vsub.f32 %v143_v33, %v154_v38  ;;  %v439_v38 = vld [vmem:[%s795_s6] ss:$0 sm:$0xff]  ;;  %s590_s6 = scalar_lea.vmem %s424_s23, 256 }
 0x195   :  { %v152_v40 = vpop.xlane.xlu0 %151  ;;  %p591_p0 = scmp.ne.s32.totalorder %s424_s23, %s590_s6  ;;  %p596_p2 = scmp.lt.s32.totalorder %s590_s6, %s590_s6 }
 0x196   :  { %v155_v41 = vmul.f32 0.03125, %v152_v40  ;;  %v158_v42 = vmul.f32 %v156_v39, %v156_v39 }
 0x197   :  { %p597_p3 = por %p596_p2, %p595_p1 }
 0x198   :  { %v157_v43 = vsub.f32 %v144_v35, %v155_v41  ;;  %v160_v44 = vsel %vm37_vm0, %v158_v42, 0.0 }
 0x199   :  { %161 = vadd.xlane.f32.xlu1 %v160_v44  ;;  %p598_p4 = pnand %p597_p3, %p591_p0 }
 0x19a   :  { %v159_v45 = vmul.f32 %v157_v43, %v157_v43 }
 0x19c   :  { %v163_v46 = vsel %vm37_vm0, %v159_v45, 0.0  ;;  %v440_v45 = vld [vmem:[%s797_s8] ss:$0 sm:$0xff] }
 0x19d   :  { %164 = vadd.xlane.f32.xlu1 %v163_v46 }
 0x226   :  { %v162_v53 = vpop.xlane.xlu1 %161 }
 0x227   :  { %v166_v54 = vmul.f32 0.03125, %v162_v53 }
 0x229   :  { %v168_v55 = vadd.f32 1e-05, %v166_v54 }
 0x22a   :  { %v165_v56 = vpop.xlane.xlu1 %164 }
 0x22b   :  { %582 = vrsqrt.f32 %v168_v55  ;;  %v167_v57 = vmul.f32 0.03125, %v165_v56 }
 0x22d   :  { %v169_v58 = vadd.f32 1e-05, %v167_v57 }
 0x22f   :  { %584 = vrsqrt.f32 %v169_v58 }
 0x235   :  { %v583_v59 = vpop.eup %582 }
 0x236   :  { %v172_v61 = vmul.f32 %v583_v59, %v156_v39 }
 0x238   :  { %v180_v63 = vmul.f32 %v434_v60, %v172_v61 }
 0x239   :  { %v585_v0 = vpop.eup %584 }
 0x23a   :  { %v173_v1 = vmul.f32 %v585_v0, %v157_v43  ;;  %v188_v2 = vadd.f32 %v435_v62, %v180_v63 }
 0x23c   :  { %v181_v3 = vmul.f32 %v434_v60, %v173_v1  ;;  %v190_v4 = vmax.f32 %v188_v2, 0.0 }
 0x23e   :  { %v189_v5 = vadd.f32 %v435_v62, %v181_v3  ;;  %516 = vmatprep.mubr.msk.f32.mxu1 %vm37_vm0, %v190_v4 }
 0x240   :  { %v191_v6 = vmax.f32 %v189_v5, 0.0 }
 0x242   :  { %517 = vmatmul.mubr.msk.f32.vlgmr.msra.gmra.mrb[0].mxu1 %vm37_vm0, %v191_v6 }
 0x243   :  { %573 = vmatpush3.bf16.msra.mxu1 %v570_v23 }
 0x244   :  { %575 = vmatprep.subr.bf16.mxu1 %v574_v26 }
 0x247   :  { %577 = vmatpush3.bf16.msra.mxu1 %v574_v26 }
 0x315   :  { %v518_v7 = vpop.f32.mrb[0].mxu1 }
 0x316   :  { %v268_v8 = vpop.f32.mrb[1].mxu1  ;;  %v282_v9 = vsel %vm37_vm0, %v518_v7, 0.0 }
 0x317   :  { %283 = vadd.xlane.f32.xlu1 %v282_v9  ;;  %v279_v10 = vsel %vm37_vm0, %v268_v8, 0.0 }
 0x318   :  { %280 = vadd.xlane.f32.xlu0 %v279_v10 }
 0x3a4   :  { %v284_v11 = vpop.xlane.xlu1 %283 }
 0x3a5   :  { %v286_v12 = vmul.f32 0.03125, %v284_v11  ;;  %v281_v13 = vpop.xlane.xlu0 %280 }
 0x3a6   :  { %v285_v14 = vmul.f32 0.03125, %v281_v13 }
 0x3a7   :  { %v288_v15 = vsub.f32 %v518_v7, %v286_v12 }
 0x3a8   :  { %v287_v16 = vsub.f32 %v268_v8, %v285_v14 }
 0x3a9   :  { %v290_v17 = vmul.f32 %v288_v15, %v288_v15 }
 0x3aa   :  { %v289_v18 = vmul.f32 %v287_v16, %v287_v16 }
 0x3ab   :  { %v294_v19 = vsel %vm37_vm0, %v290_v17, 0.0 }
 0x3ac   :  { %295 = vadd.xlane.f32.xlu1 %v294_v19  ;;  %v291_v20 = vsel %vm37_vm0, %v289_v18, 0.0 }
 0x3ad   :  { %292 = vadd.xlane.f32.xlu0 %v291_v20 }
 0x439   :  { %v296_v27 = vpop.xlane.xlu1 %295 }
 0x43a   :  { %v298_v28 = vmul.f32 0.03125, %v296_v27  ;;  %v293_v29 = vpop.xlane.xlu0 %292 }
 0x43b   :  { %v297_v30 = vmul.f32 0.03125, %v293_v29 }
 0x43c   :  { %v300_v31 = vadd.f32 1e-05, %v298_v28 }
 0x43d   :  { %v299_v32 = vadd.f32 1e-05, %v297_v30 }
 0x43e   :  { %586 = vrsqrt.f32 %v300_v31 }
 0x43f   :  { %588 = vrsqrt.f32 %v299_v32 }
 0x448   :  { %v587_v33 = vpop.eup %586 }
 0x449   :  { %v589_v35 = vpop.eup %588  ;;  %v304_v36 = vmul.f32 %v587_v33, %v288_v15 }
 0x44a   :  { %v303_v37 = vmul.f32 %v589_v35, %v287_v16 }
 0x44b   :  { %v312_v39 = vmul.f32 %v438_v34, %v304_v36 }
 0x44c   :  { %v311_v40 = vmul.f32 %v438_v34, %v303_v37 }
 0x44d   :  { %v320_v41 = vadd.f32 %v439_v38, %v312_v39 }
 0x44e   :  { %v319_v42 = vadd.f32 %v439_v38, %v311_v40 }
 0x44f   :  { %v322_v44 = vmax.f32 %v320_v41, 0.0 }
 0x450   :  { %v321_v43 = vmax.f32 %v319_v42, 0.0 }
 0x452   :  { %527 = vmatprep.mubr.msk.f32.mxu1 %vm37_vm0, %v321_v43 }
 0x453   :  { %528 = vmatmul.mubr.msk.f32.vlgmr.msra.gmra.mrb[2].mxu1 %vm37_vm0, %v322_v44 }
 0x526   :  { %v529_v46 = vpop.f32.mrb[2].mxu1 }
 0x527   :  { %v412_v47 = vadd.f32 %v529_v46, %v440_v45  ;;  %v406_v48 = vpop.f32.mrb[3].mxu1 }
 0x528   :  { %v407_v49 = vadd.f32 %v440_v45, %v406_v48 }
 0x529   :  { %417 = vst.msk [vmem:[#allocation3 + $0x8] sm:$0xff] %vm415_vm1, %v412_v47 }
 0x52a   :  { %416 = vst.msk [vmem:[#allocation3] sm:$0xff] %vm415_vm1, %v407_v49 }
 0x52b   :  { %601 = shalt.err (!%p598_p4)
}
 0x52c   :  { %s602_s8 = scalar_lea.hbm %s798_s9, 256 }
 0x52d   :  { %p603_p5 = scmp.ne.s32.totalorder %s798_s9, %s602_s8  ;;  %p606_p6 = scmp.lt.u32.totalorder %s602_s8, %s798_s9 }
 0x52f   :  { %p608_p7 = pnand %p606_p6, %p603_p5 }
 0x531   :  { %611 = shalt.err (!%p608_p7)
}
 0x532   :  { %s616_s28 = smov 128   ;;  %s617_s29 = smov 8  }
 0x533   :  { %429 = dma.vmem_to_hbm [thread:$0]  %s424_s23, 256, %s798_s9, [#allocation4], %s616_s28, %s616_s28, %s617_s29  }
 0x534   :  { %612 = dma.done.wait [#allocation4], 256  }
 0x535   :  { %613 = vsyncadd [#allocation4], 4294967040 }
 0x536   :  { %433 = vsyncpa [#allocation4], 1 }

</bundles_post_ra>
